<compile_context>
chip_gen: v7x
topology: tpu7x:2x2x1
jax: 0.10.0
libtpu: 0.0.40
codegen_flags: <defaults>
</compile_context>

<pallas_src>
import math

import jax
import jax.numpy as jnp
from jax.experimental import pallas as pl
from jax.experimental.pallas import tpu as pltpu


def _round_up(x, m):
    return ((x + m - 1) // m) * m


def foundation_fc_kernel(x_ref, pool_sel_ref, w_emb_ref, b_emb_ref,
                         w_head_ref, b_head_ref, out_ref, acc_ref):
    """Grid = (batch_block, hw_block); hw is the (last, arbitrary) reduction axis.

    x_ref:        (TB*C, THW)  f32 tile of the flattened input
    pool_sel_ref: (TB, TB*C)   constant 0/1 row->batch selection matrix
    w_emb_ref:    (TB*C, D)    w_emb/(H*W) tiled per batch-row
    b_emb_ref:    (1, D)
    w_head_ref:   (D, Npad)
    b_head_ref:   (1, Npad)
    out_ref:      (TB, Npad)
    acc_ref:      (TB*C, 1)    f32 raw spatial-sum accumulator (VMEM scratch)
    """
    hw = pl.program_id(1)

    @pl.when(hw == 0)
    def _():
        acc_ref[...] = jnp.zeros_like(acc_ref)

    # --- per-tile spatial sum on the MXU (keeps VALU/XLU slots free) ---
    x = x_ref[...]                                            # (TB*C, THW)
    ones_col = jnp.ones((x.shape[1], 1), dtype=jnp.float32)   # constant splat
    acc_ref[...] += jnp.dot(x, ones_col,
                            preferred_element_type=jnp.float32)  # (TB*C, 1)

    # --- finalize: pooled-mean -> embed -> ReLU -> linear probe ---
    @pl.when(hw == pl.num_programs(1) - 1)
    def _():
        sums = acc_ref[...]                                   # (TB*C, 1) raw sums
        # mean @ w_emb fused as (P @ (sums * W_tiled)); 1/HW already folded in.
        contrib = sums * w_emb_ref[...]                       # (TB*C, D)
        feats = jnp.dot(pool_sel_ref[...], contrib,
                        preferred_element_type=jnp.float32)   # (TB, D)
        feats = jnp.maximum(feats + b_emb_ref[...], 0.0)
        logits = jnp.dot(feats, w_head_ref[...],
                         preferred_element_type=jnp.float32)  # (TB, Npad)
        out_ref[...] = (logits + b_head_ref[...]).astype(out_ref.dtype)


def foundation_fc_forward(x_nchw, w_emb, b_emb, w_head, b_head,
                          *, batch_tile=8, hw_tile=None):
    """x_nchw: (B, C, H, W) f32 -> logits (B, n_way) f32.

    hw_tile=None picks the largest VMEM-friendly lane tile automatically.
    """
    B, C, H, W = x_nchw.shape
    HW = H * W
    D = w_emb.shape[1]
    n_way = w_head.shape[1]

    # ---- batch tile: smallest TB with TB*C % 8 == 0, capped by batch_tile ----
    tb_unit = 8 // math.gcd(C, 8)
    tb = min(_round_up(B, tb_unit), _round_up(batch_tile, tb_unit))
    b_pad = _round_up(B, tb)
    rows = tb * C

    # ---- HW lane tile: biggest that fits a few MiB of VMEM, minimal padding ----
    hw_128 = _round_up(HW, 128)
    if hw_tile is None:
        target_bytes = 4 << 20                      # per x block (double-buffered)
        thw_cap = max(128, (target_bytes // (rows * 4)) // 128 * 128)
    else:
        thw_cap = max(128, _round_up(hw_tile, 128))
    thw_cap = min(thw_cap, hw_128)
    n_hw = -(-hw_128 // thw_cap)                    # number of reduction steps
    thw = _round_up(-(-hw_128 // n_hw), 128)        # even split, 128-aligned
    hw_pad = thw * n_hw

    n_pad = max(128, _round_up(n_way, 128))         # lane-dense output columns

    # ---- wrapper-side constant prep (done once, reused for every batch) ----
    x_flat = x_nchw.astype(jnp.float32).reshape(B, C, HW)
    x_flat = jnp.pad(x_flat, ((0, b_pad - B), (0, 0), (0, hw_pad - HW)))
    x2d = x_flat.reshape(b_pad * C, hw_pad)         # rows = (batch, channel) pairs

    # row -> batch selection (TB, TB*C) and per-row embed weight with 1/HW folded
    pool_sel = jnp.repeat(jnp.eye(tb, dtype=jnp.float32), C, axis=1)        # (TB, TB*C)
    w_emb_tiled = jnp.tile(w_emb.astype(jnp.float32) / float(HW), (tb, 1))  # (TB*C, D)

    b_emb2 = b_emb.reshape(1, D).astype(jnp.float32)
    w_head_p = jnp.pad(w_head.astype(jnp.float32), ((0, 0), (0, n_pad - n_way)))
    b_head_p = jnp.pad(b_head.astype(jnp.float32), (0, n_pad - n_way)).reshape(1, n_pad)

    grid = (b_pad // tb, hw_pad // thw)

    out_padded = pl.pallas_call(
        foundation_fc_kernel,
        out_shape=jax.ShapeDtypeStruct((b_pad, n_pad), jnp.float32),
        grid_spec=pltpu.PrefetchScalarGridSpec(
            num_scalar_prefetch=0,
            grid=grid,
            in_specs=[
                pl.BlockSpec((rows, thw), lambda i, j: (i, j)),     # x stream
                pl.BlockSpec((tb, rows), lambda i, j: (0, 0)),      # pool_sel
                pl.BlockSpec((rows, D), lambda i, j: (0, 0)),       # w_emb tiled
                pl.BlockSpec((1, D), lambda i, j: (0, 0)),          # b_emb
                pl.BlockSpec((D, n_pad), lambda i, j: (0, 0)),      # w_head
                pl.BlockSpec((1, n_pad), lambda i, j: (0, 0)),      # b_head
            ],
            out_specs=pl.BlockSpec((tb, n_pad), lambda i, j: (i, 0)),
            scratch_shapes=[pltpu.VMEM((rows, 1), jnp.float32)],
        ),
        compiler_params=pltpu.CompilerParams(
            dimension_semantics=("parallel", "arbitrary"),
            vmem_limit_bytes=32 << 20,
        ),
    )(x2d, pool_sel, w_emb_tiled, b_emb2, w_head_p, b_head_p)

    return out_padded[:B, :n_way]


def reference_forward(x_nchw, w_emb, b_emb, w_head, b_head):
    pooled = jnp.mean(x_nchw, axis=(2, 3))
    feats = jnp.maximum(pooled @ w_emb + b_emb, 0.0)
    return feats @ w_head + b_head


if __name__ == "__main__":
    # Small shapes consistent with forward(): (B, C, H, W) -> (B, n_way).
    B, C, H, W = 2, 4, 16, 16
    D = 32        # backbone feature dim (stand-in for e.g. ViT embed dim)
    n_way = 5     # number of classes for the linear probe

    key = jax.random.PRNGKey(0)
    kx, k1, k2, k3, k4 = jax.random.split(key, 5)

    x = jax.random.normal(kx, (B, C, H, W), dtype=jnp.float32)
    w_emb = jax.random.normal(k1, (C, D), dtype=jnp.float32) * 0.1
    b_emb = jax.random.normal(k2, (D,), dtype=jnp.float32) * 0.01
    w_head = jax.random.normal(k3, (D, n_way), dtype=jnp.float32) * 0.1
    b_head = jax.random.normal(k4, (n_way,), dtype=jnp.float32) * 0.01

    # hw_tile=128 so the demo exercises the multi-step HW reduction grid
    # (hw_tile=None auto-sizes the lane tile for production H = W = 224 inputs).
    logits = foundation_fc_forward(x, w_emb, b_emb, w_head, b_head, hw_tile=128)
    logits = jax.block_until_ready(logits)

    ref = reference_forward(x, w_emb, b_emb, w_head, b_head)
    assert logits.shape == (B, n_way), logits.shape
    assert jnp.allclose(logits, ref, atol=1e-4, rtol=1e-4), (logits, ref)

    print("KERNEL_OK")
</pallas_src>

<mosaic_0001>
module attributes {stable_mosaic.version = 11 : i64} {
  func.func @foundation_fc_kernel(%arg0: i32, %arg1: i32, %arg2: memref<8x128xf32, #tpu.memory_space<vmem>>, %arg3: memref<2x8xf32, #tpu.memory_space<vmem>>, %arg4: memref<8x32xf32, #tpu.memory_space<vmem>>, %arg5: memref<1x32xf32, #tpu.memory_space<vmem>>, %arg6: memref<32x128xf32, #tpu.memory_space<vmem>>, %arg7: memref<1x128xf32, #tpu.memory_space<vmem>>, %arg8: memref<2x128xf32, #tpu.memory_space<vmem>>, %arg9: memref<8x1xf32, #tpu.memory_space<vmem>>) attributes {dimension_semantics = [#tpu.dimension_semantics<parallel>, #tpu.dimension_semantics<arbitrary>], iteration_bounds = array<i64: 1, 2>, scalar_prefetch = 0 : i64, scratch_operands = 1 : i64, tpu.core_type = #tpu.core_type<tc>, window_params = [{transform_indices = @transform_0, window_bounds = array<i64: 8, 128>}, {pipeline_mode = #tpu.pipeline_mode<synchronous>, transform_indices = @transform_1, window_bounds = array<i64: 2, 8>}, {pipeline_mode = #tpu.pipeline_mode<synchronous>, transform_indices = @transform_2, window_bounds = array<i64: 8, 32>}, {pipeline_mode = #tpu.pipeline_mode<synchronous>, transform_indices = @transform_3, window_bounds = array<i64: 1, 32>}, {pipeline_mode = #tpu.pipeline_mode<synchronous>, transform_indices = @transform_4, window_bounds = array<i64: 32, 128>}, {pipeline_mode = #tpu.pipeline_mode<synchronous>, transform_indices = @transform_5, window_bounds = array<i64: 1, 128>}, {transform_indices = @transform_6, window_bounds = array<i64: 2, 128>}]} {
    %c0_i32 = arith.constant 0 : i32
    %0 = arith.cmpi eq, %arg1, %c0_i32 : i32
    %1 = arith.extui %0 : i1 to i32
    %c0_i32_0 = arith.constant 0 : i32
    %2 = arith.cmpi ne, %1, %c0_i32_0 : i32
    scf.if %2 {
      %cst_8 = arith.constant 0.000000e+00 : f32
      %12 = vector.broadcast %cst_8 : f32 to vector<8x1xf32>
      %c0_9 = arith.constant 0 : index
      %c0_10 = arith.constant 0 : index
      %13 = vector.load %arg9[%c0_9, %c0_10] : memref<8x1xf32, #tpu.memory_space<vmem>>, vector<8x1xf32>
      tpu.vector_store %arg9[%c0_9, %c0_10], %12 {strides = array<i32>} : memref<8x1xf32, #tpu.memory_space<vmem>>, vector<8x1xf32>,
    } else {
    }
    %c0 = arith.constant 0 : index
    %c0_1 = arith.constant 0 : index
    %3 = vector.load %arg2[%c0, %c0_1] : memref<8x128xf32, #tpu.memory_space<vmem>>, vector<8x128xf32>
    %cst = arith.constant 1.000000e+00 : f32
    %4 = vector.broadcast %cst : f32 to vector<128x1xf32>
    %c0_2 = arith.constant 0 : index
    %c0_3 = arith.constant 0 : index
    %5 = vector.load %arg9[%c0_2, %c0_3] : memref<8x1xf32, #tpu.memory_space<vmem>>, vector<8x1xf32>
    %cst_4 = arith.constant dense<0.000000e+00> : vector<8x1xf32>
    %6 = tpu.matmul %3, %4, %cst_4 {dimension_numbers = #tpu.dot_dimension_numbers<[1], [0], [0], [1], [0, 0, 1, 1], [], []>} : vector<8x128xf32>, vector<128x1xf32>, vector<8x1xf32> -> vector<8x1xf32>
    %7 = arith.addf %5, %6 : vector<8x1xf32>
    %c0_5 = arith.constant 0 : index
    %c0_6 = arith.constant 0 : index
    %8 = vector.load %arg9[%c0_5, %c0_6] : memref<8x1xf32, #tpu.memory_space<vmem>>, vector<8x1xf32>
    tpu.vector_store %arg9[%c0_5, %c0_6], %7 {strides = array<i32>} : memref<8x1xf32, #tpu.memory_space<vmem>>, vector<8x1xf32>,
    %c1_i32 = arith.constant 1 : i32
    %9 = arith.cmpi eq, %arg1, %c1_i32 : i32
    %10 = arith.extui %9 : i1 to i32
    %c0_i32_7 = arith.constant 0 : i32
    %11 = arith.cmpi ne, %10, %c0_i32_7 : i32
    scf.if %11 {
      %c0_8 = arith.constant 0 : index
      %c0_9 = arith.constant 0 : index
      %12 = vector.load %arg9[%c0_8, %c0_9] : memref<8x1xf32, #tpu.memory_space<vmem>>, vector<8x1xf32>
      %c0_10 = arith.constant 0 : index
      %c0_11 = arith.constant 0 : index
      %13 = vector.load %arg4[%c0_10, %c0_11] : memref<8x32xf32, #tpu.memory_space<vmem>>, vector<8x32xf32>
      %14 = vector.broadcast %12 : vector<8x1xf32> to vector<8x32xf32>
      %15 = arith.mulf %14, %13 : vector<8x32xf32>
      %c0_12 = arith.constant 0 : index
      %c0_13 = arith.constant 0 : index
      %16 = vector.load %arg3[%c0_12, %c0_13] : memref<2x8xf32, #tpu.memory_space<vmem>>, vector<2x8xf32>
      %cst_14 = arith.constant dense<0.000000e+00> : vector<2x32xf32>
      %17 = tpu.matmul %16, %15, %cst_14 {dimension_numbers = #tpu.dot_dimension_numbers<[1], [0], [0], [1], [0, 0, 1, 1], [], []>} : vector<2x8xf32>, vector<8x32xf32>, vector<2x32xf32> -> vector<2x32xf32>
      %c0_15 = arith.constant 0 : index
      %c0_16 = arith.constant 0 : index
      %18 = vector.load %arg5[%c0_15, %c0_16] : memref<1x32xf32, #tpu.memory_space<vmem>>, vector<1x32xf32>
      %19 = vector.broadcast %18 : vector<1x32xf32> to vector<2x32xf32>
      %20 = arith.addf %17, %19 : vector<2x32xf32>
      %cst_17 = arith.constant 0.000000e+00 : f32
      %21 = vector.broadcast %cst_17 : f32 to vector<2x32xf32>
      %22 = arith.maximumf %20, %21 : vector<2x32xf32>
      %c0_18 = arith.constant 0 : index
      %c0_19 = arith.constant 0 : index
      %23 = vector.load %arg6[%c0_18, %c0_19] : memref<32x128xf32, #tpu.memory_space<vmem>>, vector<32x128xf32>
      %cst_20 = arith.constant dense<0.000000e+00> : vector<2x128xf32>
      %24 = tpu.matmul %22, %23, %cst_20 {dimension_numbers = #tpu.dot_dimension_numbers<[1], [0], [0], [1], [0, 0, 1, 1], [], []>} : vector<2x32xf32>, vector<32x128xf32>, vector<2x128xf32> -> vector<2x128xf32>
      %c0_21 = arith.constant 0 : index
      %c0_22 = arith.constant 0 : index
      %25 = vector.load %arg7[%c0_21, %c0_22] : memref<1x128xf32, #tpu.memory_space<vmem>>, vector<1x128xf32>
      %26 = vector.broadcast %25 : vector<1x128xf32> to vector<2x128xf32>
      %27 = arith.addf %24, %26 : vector<2x128xf32>
      %c0_23 = arith.constant 0 : index
      %c0_24 = arith.constant 0 : index
      %28 = vector.load %arg8[%c0_23, %c0_24] : memref<2x128xf32, #tpu.memory_space<vmem>>, vector<2x128xf32>
      tpu.vector_store %arg8[%c0_23, %c0_24], %27 {strides = array<i32>} : memref<2x128xf32, #tpu.memory_space<vmem>>, vector<2x128xf32>,
    } else {
    }
    return
  }
  func.func @transform_0(%arg0: i32, %arg1: i32) -> (i32, i32) {
    %c0_i32 = arith.constant 0 : i32
    return %arg0, %arg1 : i32, i32
  }
  func.func @transform_1(%arg0: i32, %arg1: i32) -> (i32, i32) {
    %c0_i32 = arith.constant 0 : i32
    %c0_i32_0 = arith.constant 0 : i32
    %c0_i32_1 = arith.constant 0 : i32
    return %c0_i32, %c0_i32_0 : i32, i32
  }
  func.func @transform_2(%arg0: i32, %arg1: i32) -> (i32, i32) {
    %c0_i32 = arith.constant 0 : i32
    %c0_i32_0 = arith.constant 0 : i32
    %c0_i32_1 = arith.constant 0 : i32
    return %c0_i32, %c0_i32_0 : i32, i32
  }
  func.func @transform_3(%arg0: i32, %arg1: i32) -> (i32, i32) {
    %c0_i32 = arith.constant 0 : i32
    %c0_i32_0 = arith.constant 0 : i32
    %c0_i32_1 = arith.constant 0 : i32
    return %c0_i32, %c0_i32_0 : i32, i32
  }
  func.func @transform_4(%arg0: i32, %arg1: i32) -> (i32, i32) {
    %c0_i32 = arith.constant 0 : i32
    %c0_i32_0 = arith.constant 0 : i32
    %c0_i32_1 = arith.constant 0 : i32
    return %c0_i32, %c0_i32_0 : i32, i32
  }
  func.func @transform_5(%arg0: i32, %arg1: i32) -> (i32, i32) {
    %c0_i32 = arith.constant 0 : i32
    %c0_i32_0 = arith.constant 0 : i32
    %c0_i32_1 = arith.constant 0 : i32
    return %c0_i32, %c0_i32_0 : i32, i32
  }
  func.func @transform_6(%arg0: i32, %arg1: i32) -> (i32, i32) {
    %c0_i32 = arith.constant 0 : i32
    %c0_i32_0 = arith.constant 0 : i32
    return %arg0, %c0_i32 : i32, i32
  }
}

</mosaic_0001>

<bundles_post_ra>
// kernel: tpu_custom_call.1
= control target key start
LH: loop header
LB: loop body
LE: loop exit
PB: predicated region body
PF: predicated region fallthrough
CT: control target
= control target key end

     0   :  { %11 = vsyncpa [#allocation4], 0  ;;  %s1322_s0 = inlined_call_operand.hbm [shape: f32[8,256], index: 0, kind: input, shape index: {}]   ;;  %s1323_s1 = inlined_call_operand.vmem [shape: f32[2,8], index: 1, kind: input, shape index: {}]   ;;  %s1324_s2 = inlined_call_operand.hbm [shape: f32[8,32], index: 2, kind: input, shape index: {}]   ;;  %s1325_s3 = inlined_call_operand.vmem [shape: f32[1,32], index: 3, kind: input, shape index: {}]   ;;  %s1326_s4 = inlined_call_operand.hbm [shape: f32[32,128], index: 4, kind: input, shape index: {}]   ;;  %s1327_s5 = inlined_call_operand.vmem [shape: f32[1,128], index: 5, kind: input, shape index: {}]   ;;  %s1328_s6 = inlined_call_operand.hbm [shape: f32[2,128], index: 6, kind: output, shape index: {}]  }
   0x1   :  { %13 = vsyncpa [#allocation4 + $0x1], 0 }
   0x2   :  { %14 = vsyncpa [#allocation7], 0 }
   0x3   :  { %15 = vsyncpa [#allocation5], 0  ;;  %s1091_s21 = smov 0   ;;  %s1093_s22 = smov 0  }
   0x4   :  { %s1095_s23 = smov 0   ;;  %s1097_s24 = smov 0  }
   0x5   :  { %s1099_s25 = smov 0   ;;  %s1101_s26 = smov 0  }
   0x6 LB: > { %s656_s27 = sadd.s32 4294967295, %s1039_s26   ;;  %p55_p0 = scmp.ne.s32.totalorder %s1023_s22, %s1019_s21  ;;  %s1039_s26 = sphi %s1101_s26, %s21_s26   ;;  %s1035_s25 = sphi %s1099_s25, %s1347_s25   ;;  %s1031_s24 = sphi %s1097_s24, %s1346_s24   ;;  %s1027_s23 = sphi %s1095_s23, %s1345_s23   ;;  %s1023_s22 = sphi %s1093_s22, %s1344_s22   ;;  %s1019_s21 = sphi %s1091_s21, %s1343_s21  }
   0x7   : > { %p1123_p1 = scmp.eq.s32.totalorder %s656_s27, 0  ;;  %p657_p2 = scmp.ge.s32.totalorder %s1039_s26, 1 }
   0x8   : > { %p197_p3 = scmp.lt.s32.totalorder %s1039_s26, 3  ;;  %s1041_s7 = smov [#allocation6]  }
   0x9   : > { %s1333_s28 = scalar_select %p1123_p1, 1, 0 }
   0xa   : > { %p1131_p4 = por %p1123_p1, %p55_p0  ;;  %p1135_p5 = pnand %p657_p2, %p197_p3 }
   0xb   : > { %s213_s8 = sshll.u32 %s1041_s7, 4  ;;  %s1042_s9 = smov [#allocation8]   ;;  %s214_s8 = int_to_ptr.vmem [resolvable:$true] %s213_s8 }
   0xc   : > { %s1334_s29 = scalar_select %p1131_p4, 1, 0 }
   0xd   : > { %s1335_s30 = scalar_select %p1135_p5, 1, 0 }
   0xe   : > { %p788_p6 = pneg %p1135_p5  ;;  %s226_s10 = sshll.u32 %s1042_s9, 4  ;;  %s1147_s10 = int_to_ptr.vmem [resolvable:$true] %s226_s10 }
   0xf   : > { %s869_s14 = scalar_lea.hbm %s1324_s2, 128 }
  0x10   : > { %p1143_p7 = pnand %p788_p6, %p1123_p1  ;;  %p870_p8 = scmp.ne.s32.totalorder %s1324_s2, %s869_s14 }
  0x11   : > { %p876_p12 = scmp.lt.u32.totalorder %s869_s14, %s1324_s2 }
  0x12   : > { %p871_p9 = pneg %p1143_p7 }
  0x14   : > { %p872_p10 = pnand %p871_p9, %p870_p8 }
  0x16   : > { %p873_p11 = pneg %p872_p10 }
  0x18   : > { %p878_p13 = pnand %p876_p12, %p873_p11 }
  0x1a   : > { %881 = shalt.err (!%p878_p13)
}
  0x1b   : > { %s882_s19 = scalar_lea.vmem %s214_s8, 128  ;;  %p890_p6 = scmp.lt.s32.totalorder %s214_s8, %s214_s8 }
  0x1c   : > { %p883_p0 = scmp.ne.s32.totalorder %s214_s8, %s882_s19  ;;  %p891_p1 = scmp.lt.s32.totalorder %s882_s19, %s882_s19 }
  0x1e   : > { %p885_p2 = pnand %p883_p0, %p871_p9  ;;  %p892_p4 = por %p891_p1, %p890_p6 }
  0x20   : > { %p886_p3 = pneg %p885_p2 }
  0x22   : > { %p893_p5 = pnand %p892_p4, %p886_p3 }
  0x24   : > { %896 = shalt.err (!%p893_p5)
}
  0x25   : > { %791 = dma.hbm_to_vmem [thread:$0]  (!%p1143_p7), %s1324_s2, 128, %s214_s8, [#allocation7]  }
  0x26   : > { %s897_s12 = scalar_lea.hbm %s1326_s4, 512 }
  0x27   : > { %p898_p8 = scmp.ne.s32.totalorder %s1326_s4, %s897_s12  ;;  %p904_p5 = scmp.lt.u32.totalorder %s897_s12, %s1326_s4 }
  0x29   : > { %p900_p1 = pnand %p898_p8, %p871_p9 }
  0x2b   : > { %p901_p4 = pneg %p900_p1 }
  0x2d   : > { %p906_p10 = pnand %p904_p5, %p901_p4 }
  0x2f   : > { %909 = shalt.err (!%p906_p10)
}
  0x30   : > { %s910_s8 = scalar_lea.vmem %s1147_s10, 512  ;;  %p918_p0 = scmp.lt.s32.totalorder %s1147_s10, %s1147_s10 }
  0x31   : > { %p911_p11 = scmp.ne.s32.totalorder %s1147_s10, %s910_s8  ;;  %p919_p2 = scmp.lt.s32.totalorder %s910_s8, %s910_s8 }
  0x33   : > { %p913_p12 = pnand %p911_p11, %p871_p9  ;;  %p920_p3 = por %p919_p2, %p918_p0 }
  0x35   : > { %p914_p13 = pneg %p913_p12 }
  0x37   : > { %p921_p6 = pnand %p920_p3, %p914_p13 }
  0x39   : > { %924 = shalt.err (!%p921_p6)
}
  0x3a   : > { %s1043_s17 = smov 128   ;;  %s1044_s18 = smov 8  }
  0x3b   : > { %794 = dma.hbm_to_vmem [thread:$0]  (!%p1143_p7), %s1326_s4, 512, %s1147_s10, [#allocation7], %s1043_s17, %s1043_s17, %s1044_s18  }
  0x3c   : > { %s30_s21 = sadd.s32 1, %s1035_s25  ;;  %s42_s7 = sadd.s32 1, %s1027_s23 }
  0x3d   : > { %p31_p9 = scmp.ge.s32.totalorder %s30_s21, 2  ;;  %p49_p8 = scmp.ne.s32.totalorder %s1027_s23, %s1023_s22 }
  0x3e   : > { %p50_p1 = scmp.eq.s32.totalorder %s1039_s26, 0  ;;  %p801_p4 = scmp.lt.s32.totalorder %s1039_s26, 2 }
  0x3f   : > { %s1349_s21 = smov (%p31_p9, %s30_s21), 0  ;;  %s243_s9 = sand.u32 1, %s1027_s23  }
  0x40   : > { %p51_p5 = por %p50_p1, %p49_p8  ;;  %s38_s12 = ssub.s32 %s1035_s25, %s1349_s21 }
  0x41   : > { %p40_p10 = scmp.eq.s32.totalorder %s38_s12, 0  ;;  %s661_s13 = sshll.u32 %s243_s9, 3 }
  0x42   : > { %s662_s11 = sshll.u32 %s1035_s25, 7  ;;  %s247_s8 = scalar_lea.vmem [#allocation3], %s661_s13 }
  0x43   : > { %s1209_s14 = scalar_select %p40_p10, %s1027_s23, %s42_s7  }
  0x44   : > { %s1214_s16 = scalar_lea.hbm %s1322_s0, %s662_s11  ;;  %s256_s17 = sshll.u32 %s247_s8, 4  ;;  %s1216_s17 = int_to_ptr.vmem [resolvable:$true] %s256_s17 }
  0x45   : > { %p1220_p7 = pnand %p801_p4, %p51_p5  ;;  %s244_s19 = scalar_lea.sflag [#allocation4], %s243_s9 }
  0x46   : > { %s925_s20 = scalar_lea.hbm %s1214_s16, 128  ;;  %s930_s13 = scalar_lea.hbm %s1322_s0, 256 }
  0x47   : > { %p926_p11 = scmp.ne.s32.totalorder %s1214_s16, %s925_s20  ;;  %p927_p12 = pneg %p1220_p7 }
  0x48   : > { %p931_p2 = scmp.lt.u32.totalorder %s1214_s16, %s1322_s0  ;;  %p932_p3 = scmp.lt.u32.totalorder %s930_s13, %s925_s20 }
  0x49   : > { %p928_p13 = pnand %p927_p12, %p926_p11  ;;  %p934_p9 = scmp.lt.u32.totalorder %s925_s20, %s1214_s16 }
  0x4a   : > { %p933_p6 = por %p932_p3, %p931_p2 }
  0x4b   : > { %p929_p0 = pneg %p928_p13 }
  0x4c   : > { %p935_p8 = por %p934_p9, %p933_p6 }
  0x4e   : > { %p936_p1 = pnand %p935_p8, %p929_p0 }
  0x50   : > { %939 = shalt.err (!%p936_p1)
}
  0x51   : > { %s940_s9 = scalar_lea.vmem %s1216_s17, 128  ;;  %s1045_s10 = smov [#allocation3]  }
  0x52   : > { %p941_p4 = scmp.ne.s32.totalorder %s1216_s17, %s940_s9  ;;  %s945_s8 = sshll.u32 %s1045_s10, 4  ;;  %s946_s8 = int_to_ptr.vmem [resolvable:$false] %s945_s8 }
  0x53   : > { %s947_s7 = scalar_lea.vmem %s946_s8, 256  ;;  %p948_p11 = scmp.lt.s32.totalorder %s1216_s17, %s946_s8 }
  0x54   : > { %p943_p5 = pnand %p941_p4, %p927_p12  ;;  %p949_p13 = scmp.lt.s32.totalorder %s947_s7, %s940_s9 }
  0x56   : > { %p944_p10 = pneg %p943_p5  ;;  %p950_p2 = por %p949_p13, %p948_p11 }
  0x58   : > { %p951_p3 = pnand %p950_p2, %p944_p10 }
  0x5a   : > { %954 = shalt.err (!%p951_p3)
}
  0x5b   : > { %798 = dma.hbm_to_vmem [thread:$0]  (!%p1220_p7), %s1214_s16, 128, %s1216_s17, %s244_s19  }
  0x5c   : > { %p1338_p0 = scmp.ne.s32.totalorder %s1335_s30, 0 }
  0x5d   : > { %s267_s20 = sand.u32 (!%p1338_p0), 1, %s1023_s22   ;;  %p1339_p12 = scmp.ne.s32.totalorder (!%p1338_p0), %s1334_s29, 0 }
  0x5e   : > { %265 = sbr.rel (%p1338_p0) target bundleno = 956 (0x3bc), region = 44  ;;  %s1252_s12 = sshll.u32 (!%p1338_p0), %s267_s20, 3 }
  0x5f   : > { %s268_s13 = scalar_lea.sflag (!%p1338_p0), [#allocation4], %s267_s20  ;;  %s271_s11 = scalar_lea.vmem (!%p1338_p0), [#allocation3], %s1252_s12 }
  0x65   : > { %1006 = dma.done.wait (%p1339_p12), %s268_s13, 128  }
  0x66   : > { %1008 = vsyncadd (%p1339_p12), %s268_s13, 4294967168  ;;  %p1340_p6 = scmp.ne.s32.totalorder %s1333_s28, 0 }
  0x68   : > { %1010 = dma.done.wait (%p1340_p6), [#allocation7], 640  }
  0x69   : > { %1012 = vsyncadd (%p1340_p6), [#allocation7], 4294966656  ;;  %p667_p7 = scmp.ne.s32.totalorder %s1031_s24, 0 }
  0x6a   : > { %vm307_vm0 = vcmask (!%p667_p7), 7168   ;;  %v1046_v0 = vmov (!%p667_p7), 0.0  }
  0x6b   : > { %306 = sbr.rel (%p667_p7) target bundleno = 114 (0x72), region = 60  ;;  %308 = vst.msk [vmem:[#allocation2] sm:$0xff] (!%p667_p7), %vm307_vm0, %v1046_v0 }
  0x72 PF: > { %v1047_v1 = vmov 0.0|0.0   ;;  %vm1048_vm1 = vmmov 0   ;;  %v1049_v2 = vmov 0.0   ;;  %v1050_v3 = vmov 1.0|1.0   ;;  %v309_v4 = vld [vmem:[%s271_s11] sm:$0xff] }
  0x73   : > { %752 = vmatprep.subr.bf16.mxu0 %v1047_v1  ;;  %733 = vmatprep.mubr.msk.f32.mxu0 %vm1048_vm1, %v1049_v2  ;;  %v310_v5 = vld [vmem:[#allocation2] sm:$0xff]  ;;  %vm382_vm2 = vcmask 7168   ;;  %p668_p9 = scmp.ne.s32.totalorder %s1031_s24, 1 }
  0x74   : > { %753 = vmatpush3.bf16.msra.mxu0 %v1050_v3  ;;  %v1051_v10 = vmov (!%p668_p9), 0   ;;  %v1052_v11 = vmov (!%p668_p9), 0.0   ;;  %vm1053_vm3 = vmmov (!%p668_p9), 0   ;;  %v479_v12 = vld [vmem:[#allocation8] sm:$0xff] (!%p668_p9)  ;;  %v480_v13 = vld [vmem:[#allocation8 + $0x8] sm:$0xff] (!%p668_p9)  ;;  %v1054_v14 = vmov (!%p668_p9), 0.0|0.0  }
  0x75   : > { %754 = vmatprep.subr.bf16.mxu0 %v1047_v1  ;;  %868 = vset.pattern.permute.xlu0 (!%p668_p9), %v1051_v10  ;;  %v769_v15 = vpack.c.bf16 (!%p668_p9), %v480_v13, %v479_v12  ;;  %v389_v16 = vld [vmem:[#allocation6] sm:$0xff] (!%p668_p9)  ;;  %v396_v19 = vld [vmem:[%s1323_s1] sm:$0x3] (!%p668_p9)  ;;  %vm404_vm4 = vcmask (!%p668_p9), 64512   ;;  %v481_v20 = vld [vmem:[#allocation8 + $0x10] sm:$0xff] (!%p668_p9)  ;;  %vm490_vm5 = vcmask (!%p668_p9), 261120  }
  0x76   : > { %749 = vmatprep.mubr.msk.f32.mxu1 (!%p668_p9), %vm1053_vm3, %v1052_v11  ;;  %768 = vmatprep.subr.bf16.mxu1 (!%p668_p9), %v1054_v14  ;;  %v482_v21 = vld [vmem:[#allocation8 + $0x18] sm:$0xff] (!%p668_p9)  ;;  %v669_v23 = vld [vmem:[%s1325_s3] ss:$0 sm:$0xff] (!%p668_p9) }
  0x77   : > { %770 = vmatpush3.bf16.msra.mxu1 (!%p668_p9), %v769_v15  ;;  %v772_v22 = vpack.c.bf16 (!%p668_p9), %v482_v21, %v481_v20  ;;  %v671_v28 = vld [vmem:[%s1327_s5] ss:$0 sm:$0xff] (!%p668_p9) }
  0x78   : > { %755 = vmatpush3.bf16.msra.mxu0 %v1050_v3  ;;  %771 = vmatprep.subr.bf16.mxu1 (!%p668_p9), %v1054_v14 }
  0x79   : > { %756 = vmatprep.subr.bf16.mxu0 %v1047_v1 }
  0x7b   : > { %773 = vmatpush3.bf16.msra.mxu1 (!%p668_p9), %v772_v22 }
  0x7c   : > { %757 = vmatpush3.bf16.msra.mxu0 %v1050_v3 }
  0x7d   : > { %758 = vmatprep.subr.bf16.mxu0 %v1047_v1 }
  0x80   : > { %759 = vmatpush3.bf16.msra.mxu0 %v1050_v3 }
  0x81   : > { %760 = vmatprep.subr.bf16.mxu0 %v1047_v1 }
  0x84   : > { %761 = vmatpush3.bf16.msra.mxu0 %v1050_v3 }
  0x85   : > { %762 = vmatprep.subr.bf16.mxu0 %v1047_v1 }
  0x88   : > { %763 = vmatpush3.bf16.msra.mxu0 %v1050_v3 }
  0x89   : > { %764 = vmatprep.subr.bf16.mxu0 %v1047_v1 }
  0x8c   : > { %765 = vmatpush3.bf16.msra.mxu0 %v1050_v3 }
  0x8d   : > { %766 = vmatprep.subr.bf16.mxu0 %v1047_v1 }
  0x90   : > { %767 = vmatpush3.bf16.msra.mxu0 %v1050_v3 }
  0x91   : > { %736 = vmatprep.subr.mxu0 (!%p668_p9), %v1052_v11 }
  0x93   : > { %734 = vmatmul.mubr.f32.vlgmr.msra.gmra.mrb[0].mxu0 %v309_v4 }
  0x94   : > { %738 = vmatprep.mubr.msk.f32.mxu0 (!%p668_p9), %vm1053_vm3, %v1052_v11 }
 0x163   : > { %387 = sbr.rel (%p668_p9) target bundleno = 931 (0x3a3), region = 64 }
 0x166   : > { %v377_v6 = vpop.f32.mrb[0].mxu0 }
 0x167   : > { %v381_v7 = vadd.f32 %v377_v6, %v310_v5  ;;  %v735_v8 = vpop.f32.mrb[1].mxu0 }
 0x169   : > { %383 = vst.msk [vmem:[#allocation2] sm:$0xff] %vm382_vm2, %v381_v7 }
 0x170   : > { %v388_v9 = vld [vmem:[#allocation2] sm:$0xff] }
 0x171   : > { %392 = vperm.xlu0 %868, %v388_v9  }
 0x1f0   : > { %v393_v17 = vpop.permute.xlu0 %392 }
 0x1f1   : > { %v395_v18 = vmul.f32 %v393_v17, %v389_v16 }
 0x1f3   : > { %737 = vmatpush3.msra.mxu0 %v395_v18 }
 0x1f4   : > { %739 = vmatmul.mubr.msk.f32.vlgmr.msra.gmra.mrb[0].mxu0 %vm404_vm4, %v396_v19 }
 0x2c7   : > { %v474_v24 = vpop.f32.mrb[0].mxu0 }
 0x2c8   : > { %v475_v25 = vadd.f32 %v669_v23, %v474_v24  ;;  %v740_v26 = vpop.f32.mrb[1].mxu0 }
 0x2ca   : > { %v478_v27 = vmax.f32 %v475_v25, 0.0 }
 0x2cc   : > { %750 = vmatmul.mubr.msk.f32.vlgmr.msra.gmra.mrb[0].mxu1 %vm490_vm5, %v478_v27 }
 0x39f   : > { %v560_v29 = vpop.f32.mrb[0].mxu1 }
 0x3a0   : > { %v561_v30 = vadd.f32 %v671_v28, %v560_v29  ;;  %v751_v31 = vpop.f32.mrb[1].mxu1 }
 0x3a2   : > { %564 = vst [vmem:[#allocation9] sm:$0x3] %v561_v30 }
 0x3a3 PF: > { %p1278_p8 = scmp.eq.s32.totalorder %s656_s27, 1  ;;  %s1055_s19 = smov [#allocation9]  }
 0x3a4   : > { %s574_s15 = sshll.u32 %s1055_s19, 4  ;;  %s575_s15 = int_to_ptr.vmem [resolvable:$true] %s574_s15 }
 0x3a5   : > { %s955_s9 = scalar_lea.vmem %s575_s15, 32  ;;  %p962_p10 = scmp.lt.s32.totalorder %s575_s15, %s575_s15 }
 0x3a6   : > { %p956_p1 = scmp.ne.s32.totalorder %s575_s15, %s955_s9  ;;  %p963_p11 = scmp.lt.s32.totalorder %s955_s9, %s955_s9 }
 0x3a8   : > { %p957_p4 = pnand %p956_p1, %p1278_p8  ;;  %p964_p13 = por %p963_p11, %p962_p10 }
 0x3aa   : > { %p958_p5 = pneg %p957_p4 }
 0x3ac   : > { %p965_p2 = pnand %p964_p13, %p958_p5 }
 0x3ae   : > { %968 = shalt.err (!%p965_p2)
}
 0x3af   : > { %s969_s27 = scalar_lea.hbm %s1328_s6, 32 }
 0x3b0   : > { %p970_p3 = scmp.ne.s32.totalorder %s1328_s6, %s969_s27  ;;  %p975_p6 = scmp.lt.u32.totalorder %s969_s27, %s1328_s6 }
 0x3b2   : > { %p971_p0 = pnand %p970_p3, %p1278_p8 }
 0x3b4   : > { %p972_p12 = pneg %p971_p0 }
 0x3b6   : > { %p977_p7 = pnand %p975_p6, %p972_p12 }
 0x3b8   : > { %980 = shalt.err (!%p977_p7)
}
 0x3b9   : > { %785 = dma.vmem_to_hbm [thread:$0]  (%p1278_p8), %s575_s15, 32, %s1328_s6, [#allocation5]  }
 0x3ba   : > { %1014 = dma.done.wait (%p1278_p8), [#allocation5], 32  }
 0x3bb   : > { %1016 = vsyncadd (%p1278_p8), [#allocation5], 4294967264 }
 0x3bc PF: > { %s21_s26 = sadd.s32 1, %s1039_s26   ;;  %s1342_s28 = smov %s1349_s21 }
 0x3bd   : > { %p18_p9 = scmp.ge.s32.totalorder %s21_s26, 4   ;;  %s1343_s21 = smov %s1023_s22 }
 0x3be   : > { %s1344_s22 = smov %s1027_s23  ;;  %s1345_s23 = smov %s1209_s14 }
 0x3bf   : > { %s1346_s24 = smov %s1035_s25  ;;  %s1347_s25 = smov %s1342_s28 }
 0x3c0   :  { %20 = sbr.rel (!%p18_p9) target bundleno = 6 (0x6), region = 98 }
 0x3c7   :  { %587 = vsyncpa [#allocation4], 1 }
 0x3c8   :  { %589 = vsyncpa [#allocation4 + $0x1], 1 }
 0x3c9   :  { %590 = vsyncpa [#allocation7], 1 }
 0x3ca   :  { %591 = vsyncpa [#allocation5], 1 }
 0x3cb   :  { %593 = vsyncpa [#allocation5 + $0x1], 1 }

</bundles_post_ra>
